<compile_context>
chip_gen: v7x
topology: tpu7x:2x2x1
jax: 0.10.0
libtpu: 0.0.40
codegen_flags: <defaults>
</compile_context>

<pallas_src>
import functools

import jax
import jax.numpy as jnp
from jax.experimental import pallas as pl
from jax.experimental.pallas import tpu as pltpu


def _round_up(x, m):
    return (x + m - 1) // m * m


def _pad2d(x, shape):
    return jnp.pad(x, [(0, t - s) for s, t in zip(x.shape, shape)])


def emotions_kernel(ids_ref, emb_row_ref, w1_ref, b1_ref, w2_ref, b2_ref,
                    out_ref, acc_ref):
    """Grid = (B, S).  The BlockSpec machinery has already gathered the
    (1, 1, E) bf16 embedding row for token ids[b, s] into VMEM.  Accumulate it
    in f32; on the last token apply the mean and the two linear layers (MXU)
    and write this batch row's padded logits."""
    del ids_ref  # only consumed by the index_maps
    s = pl.program_id(1)
    num_s = pl.num_programs(1)

    @pl.when(s == 0)
    def _init():
        acc_ref[...] = jnp.zeros_like(acc_ref)

    # bf16 row -> f32 accumulation.
    acc_ref[...] += emb_row_ref[0].astype(jnp.float32)          # (1, E)

    @pl.when(s == num_s - 1)
    def _finalize():
        sent = acc_ref[...] * (1.0 / num_s)                      # mean over S
        h = jnp.dot(sent, w1_ref[...],
                    preferred_element_type=jnp.float32) + b1_ref[...]
        out_ref[0] = (jnp.dot(h, w2_ref[...],
                              preferred_element_type=jnp.float32)
                      + b2_ref[...])


def prepare_params(emb_table, w1, b1, w2, b2):
    """One-time parameter prep (hoisted out of the per-call forward):
       * embedding table -> bfloat16, reshaped (V, 1, E) for the row-gather
         BlockSpec (accumulation stays f32 in-kernel),
       * fc weights/biases zero-padded on the MXU N dims only
         (hidden 50 -> 128, classes 6 -> 128); E itself is not padded."""
    E, H = w1.shape
    C = w2.shape[1]
    H_pad = _round_up(H, 128)
    C_pad = _round_up(C, 128)
    emb_p = emb_table.astype(jnp.bfloat16).reshape(emb_table.shape[0], 1, E)
    w1_p = _pad2d(w1, (E, H_pad))
    b1_p = _pad2d(b1.reshape(1, H), (1, H_pad))
    w2_p = _pad2d(w2, (H_pad, C_pad))
    b2_p = _pad2d(b2.reshape(1, C), (1, C_pad))
    return emb_p, w1_p, b1_p, w2_p, b2_p


@functools.partial(jax.jit, static_argnames=("num_classes",))
def emotions_forward(text_ids, emb_p, w1_p, b1_p, w2_p, b2_p, *, num_classes):
    """text_ids: (B, S) int32, assumed in [0, V) (as nn.Embedding requires).
    Params as returned by prepare_params."""
    B, S = text_ids.shape
    _, _, E = emb_p.shape
    H_pad = w1_p.shape[1]
    C_pad = w2_p.shape[1]

    out_p = pl.pallas_call(
        emotions_kernel,
        out_shape=jax.ShapeDtypeStruct((B, 1, C_pad), jnp.float32),
        grid_spec=pltpu.PrefetchScalarGridSpec(
            num_scalar_prefetch=1,              # ids -> SMEM, seen by index_maps
            grid=(B, S),
            in_specs=[
                # Data-dependent gather: one embedding row per (b, s) step.
                pl.BlockSpec((1, 1, E), lambda b, s, ids: (ids[b, s], 0, 0)),
                pl.BlockSpec((E, H_pad), lambda b, s, ids: (0, 0)),      # w1 resident
                pl.BlockSpec((1, H_pad), lambda b, s, ids: (0, 0)),      # b1
                pl.BlockSpec((H_pad, C_pad), lambda b, s, ids: (0, 0)),  # w2
                pl.BlockSpec((1, C_pad), lambda b, s, ids: (0, 0)),      # b2
            ],
            out_specs=pl.BlockSpec((1, 1, C_pad), lambda b, s, ids: (b, 0, 0)),
            scratch_shapes=[pltpu.VMEM((1, E), jnp.float32)],
        ),
        compiler_params=pltpu.CompilerParams(
            dimension_semantics=("parallel", "arbitrary"),   # batch x token-reduce
        ),
    )(text_ids, emb_p, w1_p, b1_p, w2_p, b2_p)

    return out_p.reshape(B, C_pad)[:, :num_classes]


def init_params(key, vocab_size, embed_dim, num_classes, hidden=50):
    k_emb, k_w1, k_b1, k_w2, k_b2 = jax.random.split(key, 5)
    # nn.Embedding default: N(0, 1)
    emb_table = jax.random.normal(k_emb, (vocab_size, embed_dim), jnp.float32)
    # nn.Linear default: U(-1/sqrt(fan_in), 1/sqrt(fan_in)); stored as [in, out]
    lim1 = 1.0 / jnp.sqrt(embed_dim)
    w1 = jax.random.uniform(k_w1, (embed_dim, hidden), jnp.float32, -lim1, lim1)
    b1 = jax.random.uniform(k_b1, (hidden,), jnp.float32, -lim1, lim1)
    lim2 = 1.0 / jnp.sqrt(hidden)
    w2 = jax.random.uniform(k_w2, (hidden, num_classes), jnp.float32, -lim2, lim2)
    b2 = jax.random.uniform(k_b2, (num_classes,), jnp.float32, -lim2, lim2)
    return emb_table, w1, b1, w2, b2


def reference_forward(text_ids, emb_table_f32, w1, b1, w2, b2):
    embedded = jnp.take(emb_table_f32, text_ids, axis=0)     # (B, S, E)
    sent = jnp.mean(embedded, axis=1)                        # (B, E)
    return (sent @ w1 + b1.reshape(1, -1)) @ w2 + b2.reshape(1, -1)


if __name__ == "__main__":
    VOCAB = 512
    EMBED_DIM = 32
    NUM_CLASSES = 6
    BATCH = 2
    SEQ = 8

    key = jax.random.PRNGKey(0)
    k_params, k_ids = jax.random.split(key)

    emb_table, w1, b1, w2, b2 = init_params(k_params, VOCAB, EMBED_DIM,
                                            NUM_CLASSES)
    text_ids = jax.random.randint(k_ids, (BATCH, SEQ), 0, VOCAB,
                                  dtype=jnp.int32)

    # One-time parameter prep (bf16 table, MXU-dim padding) -- off the hot path.
    emb_p, w1_p, b1_p, w2_p, b2_p = prepare_params(emb_table, w1, b1, w2, b2)

    out = emotions_forward(text_ids, emb_p, w1_p, b1_p, w2_p, b2_p,
                           num_classes=NUM_CLASSES)
    out = jax.block_until_ready(out)

    # Reference uses the same bf16-rounded table (upcast to f32), so both paths
    # do identical-precision arithmetic; only summation order differs.
    ref = reference_forward(text_ids,
                            emb_table.astype(jnp.bfloat16).astype(jnp.float32),
                            w1, b1, w2, b2)
    assert out.shape == (BATCH, NUM_CLASSES)
    assert jnp.allclose(out, ref, atol=1e-4, rtol=1e-4), (out, ref)

    print("KERNEL_OK")
</pallas_src>

<mosaic_0001>
module attributes {stable_mosaic.version = 11 : i64} {
  func.func @emotions_kernel(%arg0: i32, %arg1: i32, %arg2: memref<2x8xi32, #tpu.memory_space<smem>>, %arg3: memref<1x1x32xbf16, #tpu.memory_space<vmem>>, %arg4: memref<32x128xf32, #tpu.memory_space<vmem>>, %arg5: memref<1x128xf32, #tpu.memory_space<vmem>>, %arg6: memref<128x128xf32, #tpu.memory_space<vmem>>, %arg7: memref<1x128xf32, #tpu.memory_space<vmem>>, %arg8: memref<1x1x128xf32, #tpu.memory_space<vmem>>, %arg9: memref<1x32xf32, #tpu.memory_space<vmem>>) attributes {dimension_semantics = [#tpu.dimension_semantics<parallel>, #tpu.dimension_semantics<arbitrary>], iteration_bounds = array<i64: 2, 8>, scalar_prefetch = 1 : i64, scratch_operands = 1 : i64, tpu.core_type = #tpu.core_type<tc>, window_params = [{transform_indices = @transform_0, window_bounds = array<i64: 1, 1, 32>}, {pipeline_mode = #tpu.pipeline_mode<synchronous>, transform_indices = @transform_1, window_bounds = array<i64: 32, 128>}, {pipeline_mode = #tpu.pipeline_mode<synchronous>, transform_indices = @transform_2, window_bounds = array<i64: 1, 128>}, {pipeline_mode = #tpu.pipeline_mode<synchronous>, transform_indices = @transform_3, window_bounds = array<i64: 128, 128>}, {pipeline_mode = #tpu.pipeline_mode<synchronous>, transform_indices = @transform_4, window_bounds = array<i64: 1, 128>}, {transform_indices = @transform_5, window_bounds = array<i64: 1, 1, 128>}]} {
    %c0_i32 = arith.constant 0 : i32
    %0 = arith.cmpi eq, %arg1, %c0_i32 : i32
    %1 = arith.extui %0 : i1 to i32
    %c0_i32_0 = arith.constant 0 : i32
    %2 = arith.cmpi ne, %1, %c0_i32_0 : i32
    scf.if %2 {
      %cst = arith.constant 0.000000e+00 : f32
      %12 = vector.broadcast %cst : f32 to vector<1x32xf32>
      %c0_8 = arith.constant 0 : index
      %c0_9 = arith.constant 0 : index
      %13 = vector.load %arg9[%c0_8, %c0_9] : memref<1x32xf32, #tpu.memory_space<vmem>>, vector<1x32xf32>
      tpu.vector_store %arg9[%c0_8, %c0_9], %12 {strides = array<i32>} : memref<1x32xf32, #tpu.memory_space<vmem>>, vector<1x32xf32>,
    } else {
    }
    %c0 = arith.constant 0 : index
    %c0_1 = arith.constant 0 : index
    %3 = vector.load %arg9[%c0, %c0_1] : memref<1x32xf32, #tpu.memory_space<vmem>>, vector<1x32xf32>
    %c0_2 = arith.constant 0 : index
    %c0_3 = arith.constant 0 : index
    %c0_4 = arith.constant 0 : index
    %4 = vector.load %arg3[%c0_2, %c0_3, %c0_4] : memref<1x1x32xbf16, #tpu.memory_space<vmem>>, vector<1x1x32xbf16>
    %5 = vector.shape_cast %4 : vector<1x1x32xbf16> to vector<1x32xbf16>
    %6 = arith.extf %5 : vector<1x32xbf16> to vector<1x32xf32>
    %7 = arith.addf %3, %6 : vector<1x32xf32>
    %c0_5 = arith.constant 0 : index
    %c0_6 = arith.constant 0 : index
    %8 = vector.load %arg9[%c0_5, %c0_6] : memref<1x32xf32, #tpu.memory_space<vmem>>, vector<1x32xf32>
    tpu.vector_store %arg9[%c0_5, %c0_6], %7 {strides = array<i32>} : memref<1x32xf32, #tpu.memory_space<vmem>>, vector<1x32xf32>,
    %c7_i32 = arith.constant 7 : i32
    %9 = arith.cmpi eq, %arg1, %c7_i32 : i32
    %10 = arith.extui %9 : i1 to i32
    %c0_i32_7 = arith.constant 0 : i32
    %11 = arith.cmpi ne, %10, %c0_i32_7 : i32
    scf.if %11 {
      %c0_8 = arith.constant 0 : index
      %c0_9 = arith.constant 0 : index
      %12 = vector.load %arg9[%c0_8, %c0_9] : memref<1x32xf32, #tpu.memory_space<vmem>>, vector<1x32xf32>
      %cst = arith.constant 1.250000e-01 : f32
      %13 = vector.broadcast %cst : f32 to vector<1x32xf32>
      %14 = arith.mulf %12, %13 : vector<1x32xf32>
      %c0_10 = arith.constant 0 : index
      %c0_11 = arith.constant 0 : index
      %15 = vector.load %arg4[%c0_10, %c0_11] : memref<32x128xf32, #tpu.memory_space<vmem>>, vector<32x128xf32>
      %cst_12 = arith.constant dense<0.000000e+00> : vector<1x128xf32>
      %16 = tpu.matmul %14, %15, %cst_12 {dimension_numbers = #tpu.dot_dimension_numbers<[1], [0], [0], [1], [0, 0, 1, 1], [], []>} : vector<1x32xf32>, vector<32x128xf32>, vector<1x128xf32> -> vector<1x128xf32>
      %c0_13 = arith.constant 0 : index
      %c0_14 = arith.constant 0 : index
      %17 = vector.load %arg5[%c0_13, %c0_14] : memref<1x128xf32, #tpu.memory_space<vmem>>, vector<1x128xf32>
      %18 = arith.addf %16, %17 : vector<1x128xf32>
      %c0_15 = arith.constant 0 : index
      %c0_16 = arith.constant 0 : index
      %19 = vector.load %arg6[%c0_15, %c0_16] : memref<128x128xf32, #tpu.memory_space<vmem>>, vector<128x128xf32>
      %cst_17 = arith.constant dense<0.000000e+00> : vector<1x128xf32>
      %20 = tpu.matmul %18, %19, %cst_17 {dimension_numbers = #tpu.dot_dimension_numbers<[1], [0], [0], [1], [0, 0, 1, 1], [], []>} : vector<1x128xf32>, vector<128x128xf32>, vector<1x128xf32> -> vector<1x128xf32>
      %c0_18 = arith.constant 0 : index
      %c0_19 = arith.constant 0 : index
      %21 = vector.load %arg7[%c0_18, %c0_19] : memref<1x128xf32, #tpu.memory_space<vmem>>, vector<1x128xf32>
      %22 = arith.addf %20, %21 : vector<1x128xf32>
      %c0_20 = arith.constant 0 : index
      %c0_21 = arith.constant 0 : index
      %c0_22 = arith.constant 0 : index
      %23 = vector.load %arg8[%c0_20, %c0_21, %c0_22] : memref<1x1x128xf32, #tpu.memory_space<vmem>>, vector<1x1x128xf32>
      %24 = vector.shape_cast %23 : vector<1x1x128xf32> to vector<1x128xf32>
      %25 = vector.shape_cast %22 : vector<1x128xf32> to vector<1x1x128xf32>
      tpu.vector_store %arg8[%c0_20, %c0_21, %c0_22], %25 {strides = array<i32>} : memref<1x1x128xf32, #tpu.memory_space<vmem>>, vector<1x1x128xf32>,
    } else {
    }
    return
  }
  func.func @transform_0(%arg0: i32, %arg1: i32, %arg2: memref<2x8xi32, #tpu.memory_space<smem>>) -> (i32, i32, i32) {
    %0 = arith.index_cast %arg0 : i32 to index
    %1 = arith.index_cast %arg1 : i32 to index
    %2 = memref.load %arg2[%0, %1] : memref<2x8xi32, #tpu.memory_space<smem>>
    %c0_i32 = arith.constant 0 : i32
    %c0_i32_0 = arith.constant 0 : i32
    %c0_i32_1 = arith.constant 0 : i32
    return %2, %c0_i32, %c0_i32_0 : i32, i32, i32
  }
  func.func @transform_1(%arg0: i32, %arg1: i32, %arg2: memref<2x8xi32, #tpu.memory_space<smem>>) -> (i32, i32) {
    %c0_i32 = arith.constant 0 : i32
    %c0_i32_0 = arith.constant 0 : i32
    %c0_i32_1 = arith.constant 0 : i32
    return %c0_i32, %c0_i32_0 : i32, i32
  }
  func.func @transform_2(%arg0: i32, %arg1: i32, %arg2: memref<2x8xi32, #tpu.memory_space<smem>>) -> (i32, i32) {
    %c0_i32 = arith.constant 0 : i32
    %c0_i32_0 = arith.constant 0 : i32
    %c0_i32_1 = arith.constant 0 : i32
    return %c0_i32, %c0_i32_0 : i32, i32
  }
  func.func @transform_3(%arg0: i32, %arg1: i32, %arg2: memref<2x8xi32, #tpu.memory_space<smem>>) -> (i32, i32) {
    %c0_i32 = arith.constant 0 : i32
    %c0_i32_0 = arith.constant 0 : i32
    %c0_i32_1 = arith.constant 0 : i32
    return %c0_i32, %c0_i32_0 : i32, i32
  }
  func.func @transform_4(%arg0: i32, %arg1: i32, %arg2: memref<2x8xi32, #tpu.memory_space<smem>>) -> (i32, i32) {
    %c0_i32 = arith.constant 0 : i32
    %c0_i32_0 = arith.constant 0 : i32
    %c0_i32_1 = arith.constant 0 : i32
    return %c0_i32, %c0_i32_0 : i32, i32
  }
  func.func @transform_5(%arg0: i32, %arg1: i32, %arg2: memref<2x8xi32, #tpu.memory_space<smem>>) -> (i32, i32, i32) {
    %c0_i32 = arith.constant 0 : i32
    %c0_i32_0 = arith.constant 0 : i32
    %c0_i32_1 = arith.constant 0 : i32
    return %arg0, %c0_i32, %c0_i32_0 : i32, i32, i32
  }
}

</mosaic_0001>

<bundles_post_ra>
// kernel: emotions_forward.1
= control target key start
LH: loop header
LB: loop body
LE: loop exit
PB: predicated region body
PF: predicated region fallthrough
CT: control target
= control target key end

     0   :  { %s1097_s0 = inlined_call_operand.vmem [shape: s32[2,8], index: 0, kind: input, shape index: {}]   ;;  %s1098_s1 = inlined_call_operand.vmem [shape: bf16[512,1,32], index: 1, kind: input, shape index: {}]   ;;  %s1099_s2 = inlined_call_operand.vmem [shape: f32[32,128], index: 2, kind: input, shape index: {}]   ;;  %s1100_s3 = inlined_call_operand.vmem [shape: f32[1,128], index: 3, kind: input, shape index: {}]   ;;  %s1101_s4 = inlined_call_operand.vmem [shape: f32[128,128], index: 4, kind: input, shape index: {}]   ;;  %s1102_s5 = inlined_call_operand.vmem [shape: f32[1,128], index: 5, kind: input, shape index: {}]   ;;  %s1103_s6 = inlined_call_operand.hbm [shape: f32[2,1,128], index: 6, kind: output, shape index: {}]  }
   0x1   :  { %s11_s23 = sshll.u32 %s1097_s0, 4  ;;  %s12_s23 = int_to_ptr.vmem [resolvable:$true] %s11_s23 }
   0x2   :  { %s740_s24 = scalar_lea.vmem %s12_s23, 32  ;;  %p745_p1 = scmp.lt.s32.totalorder %s12_s23, %s12_s23 }
   0x3   :  { %p741_p0 = scmp.ne.s32.totalorder %s12_s23, %s740_s24  ;;  %p746_p2 = scmp.lt.s32.totalorder %s740_s24, %s740_s24 }
   0x5   :  { %p747_p3 = por %p746_p2, %p745_p1 }
   0x7   :  { %p748_p4 = pnand %p747_p3, %p741_p0 }
   0x9   :  { %751 = shalt.err (!%p748_p4)  }
   0xa   :  { %s850_s25 = smov [#allocation4]  }
   0xb   :  { %14 = dma.vmem_to_smem %s12_s23, 32, %s850_s25, [#allocation3] }
   0xc   :  { %812 = dma.done.wait [#allocation3], 32 }
   0xd   :  { %813 = vsyncadd [#allocation3], 4294967264 }
   0xe   :  { %16 = sfence }
   0xf   :  { %17 = vsyncpa [#allocation6], 0 }
  0x10   :  { %19 = vsyncpa [#allocation6 + $0x1], 0  ;;  %s894_s26 = smov 0   ;;  %s896_s27 = smov 0  }
  0x11   :  { %s898_s0 = smov 0   ;;  %s900_s28 = smov 0  }
  0x12   :  { %s902_s29 = smov 0   ;;  %s904_s30 = smov 0  }
  0x13   :  { %s906_s7 = smov 0   ;;  %s908_s8 = smov 0  }
  0x14 LB: > { %s552_s9 = sadd.s32 4294967295, %s848_s8   ;;  %s553_s10 = sadd.s32 4294967294, %s848_s8   ;;  %s848_s8 = sphi %s908_s8, %s25_s8   ;;  %s844_s7 = sphi %s906_s7, %s1112_s7   ;;  %s840_s30 = sphi %s904_s30, %s1111_s30   ;;  %s836_s29 = sphi %s902_s29, %s1110_s29   ;;  %s832_s28 = sphi %s900_s28, %s1109_s28   ;;  %s828_s0 = sphi %s898_s0, %s1108_s0   ;;  %s824_s27 = sphi %s896_s27, %s1107_s27   ;;  %s820_s26 = sphi %s894_s26, %s1106_s26  }
  0x15   : > { %s34_s11 = sadd.s32 1, %s840_s30  ;;  %s37_s12 = sadd.s32 1, %s844_s7 }
  0x16   : > { %p35_p5 = scmp.ge.s32.totalorder %s34_s11, 8  ;;  %p180_p6 = scmp.ne.s32.totalorder %s828_s0, %s824_s27 }
  0x17   : > { %p181_p7 = scmp.eq.s32.totalorder %s552_s9, 15  ;;  %p186_p9 = scmp.ne.s32.totalorder %s824_s27, %s820_s26 }
  0x18   : > { %s1114_s11 = smov (%p35_p5, %s34_s11), 0  ;;  %s1116_s12 = smov (!%p35_p5, %s37_s12), %s844_s7 }
  0x19   : > { %p943_p8 = por %p181_p7, %p180_p6  ;;  %p39_p10 = scmp.ge.s32.totalorder %s1116_s12, 2 }
  0x1a   : > { %p187_p11 = scmp.eq.s32.totalorder %s553_s10, 15  ;;  %p558_p12 = scmp.ge.s32.totalorder %s848_s8, 1 }
  0x1b   : > { %p239_p13 = scmp.lt.s32.totalorder %s848_s8, 17  ;;  %s1118_s12 = smov (%p39_p10, %s1116_s12), 0 }
  0x1c   : > { %p953_p0 = por %p187_p11, %p186_p9  ;;  %s167_s15 = ssub.s32 %s844_s7, %s1118_s12 }
  0x1d   : > { %p240_p1 = pnand %p558_p12, %p239_p13  ;;  %s170_s16 = sadd.s32 1, %s828_s0 }
  0x1e   : > { %p168_p2 = scmp.eq.s32.totalorder %s167_s15, 0  ;;  %s270_s18 = sand.u32 (!%p240_p1), 1, %s824_s27  }
  0x1f   : > { %243 = sbr.rel (%p240_p1) target bundleno = 515 (0x203), region = 40  ;;  %s272_s19 = sshra.s32 (!%p240_p1), %s832_s28, 7 }
  0x20   : > { %s961_s17 = scalar_select %p168_p2, %s828_s0, %s170_s16  }
  0x21   : > { %s274_s20 = sadd.s32 (!%p240_p1), %s836_s29, %s272_s19  ;;  %s277_s22 = sand.u32 (!%p240_p1), 127, %s832_s28 }
  0x22   : > { %s559_s21 = sshll.u32 (!%p240_p1), %s274_s20, 7  ;;  %s972_s15 = scalar_lea.vmem (!%p240_p1), [#allocation5], %s270_s18 }
  0x23   : > { %s278_s23 = sadd.s32 (!%p240_p1), %s559_s21, %s277_s22  ;;  %p560_p4 = scmp.ne.s32.totalorder (!%p240_p1), %s832_s28, 0 }
  0x24   : > { %s279_s24 = sld [smem:[#allocation4 + %s278_s23]] (!%p240_p1) }
  0x26   : > { %vm295_vm0 = vcmask (!%p560_p4), 253952   ;;  %v851_v0 = vmov (!%p560_p4), 0.0  }
  0x27   : > { %294 = sbr.rel (%p560_p4) target bundleno = 46 (0x2e), region = 44  ;;  %296 = vst.msk [vmem:[#allocation2] sm:$0x1] (!%p560_p4), %vm295_vm0, %v851_v0 }
  0x2a   : > { %p280_p3 = scmp.lt.s32.totalorder %s279_s24, 511 }
  0x2c   : > { %s1120_s24 = smov (!%p280_p3, %s279_s24), 511 }
  0x2d   : > { %s282_s10 = scalar_lea.vmem %s1098_s1, %s1120_s24 }
  0x2e PF: > { %v297_v1 = vld [vmem:[#allocation2] sm:$0x1]  ;;  %vm301_vm1 = vcmask 253952   ;;  %p561_p5 = scmp.ne.s32.totalorder %s832_s28, 7 }
  0x2f   : > { %v298_v2 = vld [vmem:[%s282_s10] sm:$0x1]  ;;  %v310_v6 = vld [vmem:[%s1099_s2 + $0x8] sm:$0xff] (!%p561_p5)  ;;  %v311_v7 = vld [vmem:[%s1099_s2 + $0x10] sm:$0xff] (!%p561_p5)  ;;  %v852_v8 = vmov (!%p561_p5), 0.0|0.0   ;;  %vm853_vm2 = vmmov (!%p561_p5), 0  }
  0x30   : > { %v299_v3 = vunpack.c.l.bf16 %v298_v2  ;;  %306 = sbr.rel (%p561_p5) target bundleno = 491 (0x1eb), region = 48  ;;  %v309_v5 = vld [vmem:[%s1099_s2] sm:$0xff] (!%p561_p5)  ;;  %634 = vmatprep.subr.bf16.mxu0 (!%p561_p5), %v852_v8  ;;  %v312_v10 = vld [vmem:[%s1099_s2 + $0x18] sm:$0xff] (!%p561_p5)  ;;  %v854_v11 = vmov (!%p561_p5), 0.0   ;;  %640 = vmatprep.subr.bf16.mxu1 (!%p561_p5), %v852_v8  ;;  %v389_v13 = vld [vmem:[%s1101_s4 + $0x8] sm:$0xff] (!%p561_p5)  ;;  %vm314_vm3 = vcmask (!%p561_p5), 261120  }
  0x31   : > { %v635_v9 = vpack.c.bf16 (!%p561_p5), %v310_v6, %v309_v5  ;;  %596 = vmatprep.mubr.msk.f32.mxu0 (!%p561_p5), %vm853_vm2, %v854_v11  ;;  %v388_v12 = vld [vmem:[%s1101_s4] sm:$0xff] (!%p561_p5)  ;;  %v390_v14 = vld [vmem:[%s1101_s4 + $0x10] sm:$0xff] (!%p561_p5)  ;;  %v391_v15 = vld [vmem:[%s1101_s4 + $0x18] sm:$0xff] (!%p561_p5)  ;;  %631 = vmatprep.mubr.msk.f32.mxu1 (!%p561_p5), %vm853_vm2, %v854_v11  ;;  %v638_v16 = vpack.c.bf16 (!%p561_p5), %v312_v10, %v311_v7 }
  0x32   : > { %v300_v4 = vadd.f32 %v299_v3, %v297_v1  ;;  %v641_v18 = vpack.c.bf16 (!%p561_p5), %v389_v13, %v388_v12  ;;  %v644_v19 = vpack.c.bf16 (!%p561_p5), %v391_v15, %v390_v14  ;;  %v392_v21 = vld [vmem:[%s1101_s4 + $0x20] sm:$0xff] (!%p561_p5)  ;;  %v393_v22 = vld [vmem:[%s1101_s4 + $0x28] sm:$0xff] (!%p561_p5)  ;;  %v394_v24 = vld [vmem:[%s1101_s4 + $0x30] sm:$0xff] (!%p561_p5) }
  0x33   : > { %636 = vmatpush3.bf16.msra.mxu0 (!%p561_p5), %v635_v9  ;;  %v647_v23 = vpack.c.bf16 (!%p561_p5), %v393_v22, %v392_v21  ;;  %v395_v25 = vld [vmem:[%s1101_s4 + $0x38] sm:$0xff] (!%p561_p5)  ;;  %v396_v27 = vld [vmem:[%s1101_s4 + $0x40] sm:$0xff] (!%p561_p5)  ;;  %v397_v28 = vld [vmem:[%s1101_s4 + $0x48] sm:$0xff] (!%p561_p5) }
  0x34   : > { %302 = vst.msk [vmem:[#allocation2] sm:$0x1] %vm301_vm1, %v300_v4  ;;  %637 = vmatprep.subr.bf16.mxu0 (!%p561_p5), %v852_v8  ;;  %642 = vmatpush3.bf16.msra.mxu1 (!%p561_p5), %v641_v18  ;;  %v650_v26 = vpack.c.bf16 (!%p561_p5), %v395_v25, %v394_v24  ;;  %v653_v29 = vpack.c.bf16 (!%p561_p5), %v397_v28, %v396_v27  ;;  %v398_v30 = vld [vmem:[%s1101_s4 + $0x50] sm:$0xff] (!%p561_p5)  ;;  %v399_v31 = vld [vmem:[%s1101_s4 + $0x58] sm:$0xff] (!%p561_p5)  ;;  %v400_v33 = vld [vmem:[%s1101_s4 + $0x60] sm:$0xff] (!%p561_p5) }
  0x35   : > { %643 = vmatprep.subr.bf16.mxu1 (!%p561_p5), %v852_v8  ;;  %v656_v32 = vpack.c.bf16 (!%p561_p5), %v399_v31, %v398_v30  ;;  %v401_v34 = vld [vmem:[%s1101_s4 + $0x68] sm:$0xff] (!%p561_p5)  ;;  %v402_v36 = vld [vmem:[%s1101_s4 + $0x70] sm:$0xff] (!%p561_p5)  ;;  %v403_v37 = vld [vmem:[%s1101_s4 + $0x78] sm:$0xff] (!%p561_p5) }
  0x36   : > { %v659_v35 = vpack.c.bf16 (!%p561_p5), %v401_v34, %v400_v33  ;;  %v662_v38 = vpack.c.bf16 (!%p561_p5), %v403_v37, %v402_v36  ;;  %v313_v39 = vld [vmem:[%s1100_s3] sm:$0x1] (!%p561_p5) }
  0x37   : > { %639 = vmatpush3.bf16.msra.mxu0 %v638_v16  ;;  %v404_v43 = vld [vmem:[%s1102_s5] sm:$0x1] }
  0x38   : > { %645 = vmatpush3.bf16.msra.mxu1 %v644_v19 }
  0x39   : > { %646 = vmatprep.subr.bf16.mxu1 %v852_v8 }
  0x3b   : > { %v307_v17 = vld [vmem:[#allocation2] sm:$0x1] }
  0x3c   : > { %v308_v20 = vmul.f32 0.125, %v307_v17  ;;  %648 = vmatpush3.bf16.msra.mxu1 %v647_v23 }
  0x3d   : > { %649 = vmatprep.subr.bf16.mxu1 %v852_v8 }
  0x3e   : > { %597 = vmatmul.mubr.msk.f32.vlgmr.msra.gmra.mrb[0].mxu0 %vm314_vm3, %v308_v20 }
  0x40   : > { %651 = vmatpush3.bf16.msra.mxu1 %v650_v26 }
  0x41   : > { %652 = vmatprep.subr.bf16.mxu1 %v852_v8 }
  0x44   : > { %654 = vmatpush3.bf16.msra.mxu1 %v653_v29 }
  0x45   : > { %655 = vmatprep.subr.bf16.mxu1 %v852_v8 }
  0x48   : > { %657 = vmatpush3.bf16.msra.mxu1 %v656_v32 }
  0x49   : > { %658 = vmatprep.subr.bf16.mxu1 %v852_v8 }
  0x4c   : > { %660 = vmatpush3.bf16.msra.mxu1 %v659_v35 }
  0x4d   : > { %661 = vmatprep.subr.bf16.mxu1 %v852_v8 }
  0x50   : > { %663 = vmatpush3.bf16.msra.mxu1 %v662_v38 }
 0x111   : > { %v384_v40 = vpop.f32.mrb[0].mxu0 }
 0x112   : > { %v385_v41 = vadd.f32 %v384_v40, %v313_v39  ;;  %v598_v42 = vpop.f32.mrb[1].mxu0 }
 0x114   : > { %632 = vmatmul.mubr.f32.vlgmr.msra.gmra.mrb[0].mxu1 %v385_v41 }
 0x1e7   : > { %v471_v44 = vpop.f32.mrb[0].mxu1 }
 0x1e8   : > { %v472_v45 = vadd.f32 %v471_v44, %v404_v43  ;;  %v633_v46 = vpop.f32.mrb[1].mxu1 }
 0x1ea   : > { %475 = vst [vmem:[%s972_s15] sm:$0x1] %v472_v45 }
 0x1eb PF: > { %s563_s16 = sshll.u32 %s836_s29, 4  ;;  %s489_s22 = sshll.u32 %s972_s15, 4  ;;  %s490_s22 = int_to_ptr.vmem [resolvable:$true] %s489_s22 }
 0x1ec   : > { %s1047_s21 = scalar_lea.hbm %s1103_s6, %s563_s16  ;;  %s477_s23 = scalar_lea.sflag [#allocation6], %s270_s18 }
 0x1ed   : > { %s752_s24 = scalar_lea.vmem %s490_s22, 16  ;;  %s855_s25 = smov [#allocation5]  }
 0x1ee   : > { %p753_p6 = scmp.ne.s32.totalorder %s490_s22, %s752_s24  ;;  %s756_s28 = sshll.u32 %s855_s25, 4  ;;  %s757_s28 = int_to_ptr.vmem [resolvable:$false] %s756_s28 }
 0x1ef   : > { %s758_s9 = scalar_lea.vmem %s757_s28, 32  ;;  %p759_p10 = scmp.lt.s32.totalorder %s490_s22, %s757_s28 }
 0x1f0   : > { %p754_p7 = pnand %p753_p6, %p943_p8  ;;  %p760_p11 = scmp.lt.s32.totalorder %s758_s9, %s752_s24 }
 0x1f2   : > { %p755_p9 = pneg %p754_p7  ;;  %p761_p12 = por %p760_p11, %p759_p10 }
 0x1f4   : > { %p762_p13 = pnand %p761_p12, %p755_p9 }
 0x1f6   : > { %765 = shalt.err (!%p762_p13)
}
 0x1f7   : > { %s766_s29 = scalar_lea.hbm %s1047_s21, 16  ;;  %s770_s10 = scalar_lea.hbm %s1103_s6, 32 }
 0x1f8   : > { %p767_p1 = scmp.ne.s32.totalorder %s1047_s21, %s766_s29  ;;  %p771_p4 = scmp.lt.u32.totalorder %s1047_s21, %s1103_s6 }
 0x1f9   : > { %p772_p5 = scmp.lt.u32.totalorder %s770_s10, %s766_s29  ;;  %p774_p7 = scmp.lt.u32.totalorder %s766_s29, %s1047_s21 }
 0x1fa   : > { %p768_p2 = pnand %p767_p1, %p943_p8 }
 0x1fb   : > { %p773_p6 = por %p772_p5, %p771_p4 }
 0x1fc   : > { %p769_p3 = pneg %p768_p2 }
 0x1fd   : > { %p775_p9 = por %p774_p7, %p773_p6 }
 0x1ff   : > { %p776_p10 = pnand %p775_p9, %p769_p3 }
 0x201   : > { %779 = shalt.err (!%p776_p10)
}
 0x202   : > { %664 = dma.vmem_to_hbm [thread:$0]  (%p943_p8), %s490_s22, 16, %s1047_s21, %s477_s23  }
 0x203 PF: > { %p670_p11 = scmp.ge.s32.totalorder %s848_s8, 2  ;;  %s501_s20 = sand.u32 1, %s820_s26  }
 0x204   : > { %s502_s24 = scalar_lea.sflag [#allocation6], %s501_s20 }
 0x205   : > { %p667_p12 = pnand %p670_p11, %p953_p0 }
 0x207   : > { %815 = dma.done.wait (!%p667_p12), %s502_s24, 16  }
 0x208   : > { %817 = vsyncadd (!%p667_p12), %s502_s24, 4294967280  ;;  %s25_s8 = sadd.s32 1, %s848_s8   ;;  %s1106_s26 = smov %s824_s27 }
 0x209   : > { %p22_p13 = scmp.ge.s32.totalorder %s25_s8, 18   ;;  %s1107_s27 = smov %s828_s0 }
 0x20a   : > { %s1108_s0 = smov %s961_s17  ;;  %s1109_s28 = smov %s840_s30 }
 0x20b   : > { %s1110_s29 = smov %s844_s7  ;;  %s1111_s30 = smov %s1114_s11 }
 0x20c   : > { %s1112_s7 = smov %s1118_s12  ;;  %24 = sbr.rel (!%p22_p13) target bundleno = 20 (0x14), region = 83 }
 0x213   :  { %506 = vsyncpa [#allocation6], 1 }
 0x214   :  { %508 = vsyncpa [#allocation6 + $0x1], 1 }

</bundles_post_ra>
